<compile_context>
chip_gen: v7x
topology: tpu7x:2x2x1
jax: 0.10.0
libtpu: 0.0.40
codegen_flags: <defaults>
</compile_context>

<pallas_src>
import jax
import jax.numpy as jnp
from jax.experimental import pallas as pl
from jax.experimental.pallas import tpu as pltpu


def _cross_attn_kernel(x1_ref, x2_ref, wq_ref, wkv_ref, bq_ref, bkv_ref,
                       o_ref, kv_ref):
    H = o_ref.shape[-1]

    # Compute K/V once per batch element (first query tile) and keep them
    # resident in VMEM scratch for all remaining query tiles of this batch.
    @pl.when(pl.program_id(1) == 0)
    def _():
        x2 = x2_ref[...].astype(jnp.float32)
        kv_ref[...] = (jnp.dot(x2, wkv_ref[...],
                               preferred_element_type=jnp.float32)
                       + bkv_ref[...])

    # Q projection for this query tile (MXU, f32 accumulate).
    x1 = x1_ref[...].astype(jnp.float32)
    q = jnp.dot(x1, wq_ref[...], preferred_element_type=jnp.float32) + bq_ref[...]

    k = kv_ref[:, :H]          # (S2, H)  lane-aligned slice (H % 128 == 0)
    v = kv_ref[:, H:]          # (S2, H)

    # Attention scores (TQ, S2); module applies NO 1/sqrt(d) scaling.
    scores = jnp.dot(q, k.T, preferred_element_type=jnp.float32)

    # Numerically stable softmax over the key axis (matches F.softmax).
    m = jnp.max(scores, axis=-1, keepdims=True)
    e = jnp.exp(scores - m)
    denom = jnp.sum(e, axis=-1, keepdims=True)
    w = e * pl.reciprocal(denom, approx=True)

    # Weighted sum of values -> dense (TQ, H) store.
    o_ref[...] = jnp.dot(w, v, preferred_element_type=jnp.float32).astype(o_ref.dtype)


def cross_attention_forward(x1, x2, wq, bq, wk, bk, wv, bv):
    """x1: [B, S1, E], x2: [B, S2, E], w*: [E, H], b*: [H] -> [B, S1, H]."""
    B, S1, E = x1.shape
    _, S2, _ = x2.shape
    H = wq.shape[1]

    # Fuse K and V projections into a single (E, 2H) operand.
    wkv = jnp.concatenate([wk, wv], axis=1)                 # (E, 2H)
    bkv = jnp.concatenate([bk, bv], axis=0).reshape(1, 2 * H)
    bq2 = bq.reshape(1, H)

    # Query tile size: full sequence when small, 256-row tiles when long (and
    # divisible) so the (TQ, S2) score block stays VMEM-friendly.
    TQ = S1 if (S1 <= 256 or S1 % 256 != 0) else 256
    nq = S1 // TQ

    x1_spec = pl.BlockSpec((None, TQ, E), lambda b, qi: (b, qi, 0))
    x2_spec = pl.BlockSpec((None, S2, E), lambda b, qi: (b, 0, 0))
    wq_spec = pl.BlockSpec((E, H), lambda b, qi: (0, 0))        # VMEM-resident
    wkv_spec = pl.BlockSpec((E, 2 * H), lambda b, qi: (0, 0))
    bq_spec = pl.BlockSpec((1, H), lambda b, qi: (0, 0))
    bkv_spec = pl.BlockSpec((1, 2 * H), lambda b, qi: (0, 0))
    out_spec = pl.BlockSpec((None, TQ, H), lambda b, qi: (b, qi, 0))

    return pl.pallas_call(
        _cross_attn_kernel,
        out_shape=jax.ShapeDtypeStruct((B, S1, H), jnp.float32),
        grid_spec=pltpu.PrefetchScalarGridSpec(
            num_scalar_prefetch=0,
            grid=(B, nq),
            in_specs=[x1_spec, x2_spec, wq_spec, wkv_spec, bq_spec, bkv_spec],
            out_specs=out_spec,
            scratch_shapes=[pltpu.VMEM((S2, 2 * H), jnp.float32)],
        ),
        compiler_params=pltpu.CompilerParams(
            dimension_semantics=("parallel", "arbitrary")),
    )(x1, x2, wq, wkv, bq2, bkv)


def _reference(x1, x2, wq, bq, wk, bk, wv, bv):
    q = jnp.einsum('bse,eh->bsh', x1, wq) + bq
    k = jnp.einsum('bse,eh->bsh', x2, wk) + bk
    v = jnp.einsum('bse,eh->bsh', x2, wv) + bv
    scores = jnp.einsum('bqh,bkh->bqk', q, k)
    w = jax.nn.softmax(scores, axis=-1)
    return jnp.einsum('bqk,bkh->bqh', w, v)


if __name__ == "__main__":
    B, S1, S2 = 2, 128, 128       # batch, query len, key/value len
    E, H = 128, 128               # embed_dim, head_dim (lane-aligned)

    key = jax.random.PRNGKey(0)
    k_x1, k_x2, k_wq, k_wk, k_wv, k_bq, k_bk, k_bv = jax.random.split(key, 8)

    x1 = jax.random.normal(k_x1, (B, S1, E), jnp.float32)
    x2 = jax.random.normal(k_x2, (B, S2, E), jnp.float32)

    # Linear weights stored pre-transposed as [E, H] so the kernel does x @ W.
    w_scale = 1.0 / E
    wq = jax.random.normal(k_wq, (E, H), jnp.float32) * w_scale
    wk = jax.random.normal(k_wk, (E, H), jnp.float32) * w_scale
    wv = jax.random.normal(k_wv, (E, H), jnp.float32) * w_scale
    bq = jax.random.normal(k_bq, (H,), jnp.float32) * 0.02
    bk = jax.random.normal(k_bk, (H,), jnp.float32) * 0.02
    bv = jax.random.normal(k_bv, (H,), jnp.float32) * 0.02

    out = cross_attention_forward(x1, x2, wq, bq, wk, bk, wv, bv)
    out = jax.block_until_ready(out)

    ref = _reference(x1, x2, wq, bq, wk, bk, wv, bv)
    assert out.shape == (B, S1, H)
    assert jnp.allclose(out, ref, atol=2e-2, rtol=2e-2), "mismatch vs reference"

    print("KERNEL_OK")
</pallas_src>

<mosaic_0001>
module attributes {stable_mosaic.version = 11 : i64} {
  func.func @_cross_attn_kernel(%arg0: i32, %arg1: i32, %arg2: memref<1x128x128xf32, #tpu.memory_space<vmem>>, %arg3: memref<1x128x128xf32, #tpu.memory_space<vmem>>, %arg4: memref<128x128xf32, #tpu.memory_space<vmem>>, %arg5: memref<128x256xf32, #tpu.memory_space<vmem>>, %arg6: memref<1x128xf32, #tpu.memory_space<vmem>>, %arg7: memref<1x256xf32, #tpu.memory_space<vmem>>, %arg8: memref<1x128x128xf32, #tpu.memory_space<vmem>>, %arg9: memref<128x256xf32, #tpu.memory_space<vmem>>) attributes {dimension_semantics = [#tpu.dimension_semantics<parallel>, #tpu.dimension_semantics<arbitrary>], iteration_bounds = array<i64: 2, 1>, scalar_prefetch = 0 : i64, scratch_operands = 1 : i64, tpu.core_type = #tpu.core_type<tc>, window_params = [{transform_indices = @transform_0, window_bounds = array<i64: 1, 128, 128>}, {transform_indices = @transform_1, window_bounds = array<i64: 1, 128, 128>}, {pipeline_mode = #tpu.pipeline_mode<synchronous>, transform_indices = @transform_2, window_bounds = array<i64: 128, 128>}, {pipeline_mode = #tpu.pipeline_mode<synchronous>, transform_indices = @transform_3, window_bounds = array<i64: 128, 256>}, {pipeline_mode = #tpu.pipeline_mode<synchronous>, transform_indices = @transform_4, window_bounds = array<i64: 1, 128>}, {pipeline_mode = #tpu.pipeline_mode<synchronous>, transform_indices = @transform_5, window_bounds = array<i64: 1, 256>}, {transform_indices = @transform_6, window_bounds = array<i64: 1, 128, 128>}]} {
    %c0_i32 = arith.constant 0 : i32
    %0 = arith.cmpi eq, %arg1, %c0_i32 : i32
    %1 = arith.extui %0 : i1 to i32
    %c0_i32_0 = arith.constant 0 : i32
    %2 = arith.cmpi ne, %1, %c0_i32_0 : i32
    scf.if %2 {
      %c0_17 = arith.constant 0 : index
      %c0_18 = arith.constant 0 : index
      %c0_19 = arith.constant 0 : index
      %28 = vector.load %arg3[%c0_17, %c0_18, %c0_19] : memref<1x128x128xf32, #tpu.memory_space<vmem>>, vector<1x128x128xf32>
      %29 = vector.shape_cast %28 : vector<1x128x128xf32> to vector<128x128xf32>
      %c0_20 = arith.constant 0 : index
      %c0_21 = arith.constant 0 : index
      %30 = vector.load %arg5[%c0_20, %c0_21] : memref<128x256xf32, #tpu.memory_space<vmem>>, vector<128x256xf32>
      %cst_22 = arith.constant dense<0.000000e+00> : vector<128x256xf32>
      %31 = tpu.matmul %29, %30, %cst_22 {dimension_numbers = #tpu.dot_dimension_numbers<[1], [0], [0], [1], [0, 0, 1, 1], [], []>} : vector<128x128xf32>, vector<128x256xf32>, vector<128x256xf32> -> vector<128x256xf32>
      %c0_23 = arith.constant 0 : index
      %c0_24 = arith.constant 0 : index
      %32 = vector.load %arg7[%c0_23, %c0_24] : memref<1x256xf32, #tpu.memory_space<vmem>>, vector<1x256xf32>
      %33 = vector.broadcast %32 : vector<1x256xf32> to vector<128x256xf32>
      %34 = arith.addf %31, %33 : vector<128x256xf32>
      %c0_25 = arith.constant 0 : index
      %c0_26 = arith.constant 0 : index
      %35 = vector.load %arg9[%c0_25, %c0_26] : memref<128x256xf32, #tpu.memory_space<vmem>>, vector<128x256xf32>
      tpu.vector_store %arg9[%c0_25, %c0_26], %34 {strides = array<i32>} : memref<128x256xf32, #tpu.memory_space<vmem>>, vector<128x256xf32>,
    } else {
    }
    %c0 = arith.constant 0 : index
    %c0_1 = arith.constant 0 : index
    %c0_2 = arith.constant 0 : index
    %3 = vector.load %arg2[%c0, %c0_1, %c0_2] : memref<1x128x128xf32, #tpu.memory_space<vmem>>, vector<1x128x128xf32>
    %4 = vector.shape_cast %3 : vector<1x128x128xf32> to vector<128x128xf32>
    %c0_3 = arith.constant 0 : index
    %c0_4 = arith.constant 0 : index
    %5 = vector.load %arg4[%c0_3, %c0_4] : memref<128x128xf32, #tpu.memory_space<vmem>>, vector<128x128xf32>
    %cst = arith.constant dense<0.000000e+00> : vector<128x128xf32>
    %6 = tpu.matmul %4, %5, %cst {dimension_numbers = #tpu.dot_dimension_numbers<[1], [0], [0], [1], [0, 0, 1, 1], [], []>} : vector<128x128xf32>, vector<128x128xf32>, vector<128x128xf32> -> vector<128x128xf32>
    %c0_5 = arith.constant 0 : index
    %c0_6 = arith.constant 0 : index
    %7 = vector.load %arg6[%c0_5, %c0_6] : memref<1x128xf32, #tpu.memory_space<vmem>>, vector<1x128xf32>
    %8 = vector.broadcast %7 : vector<1x128xf32> to vector<128x128xf32>
    %9 = arith.addf %6, %8 : vector<128x128xf32>
    %c0_7 = arith.constant 0 : index
    %c0_8 = arith.constant 0 : index
    %10 = vector.load %arg9[%c0_7, %c0_8] : memref<128x256xf32, #tpu.memory_space<vmem>>, vector<128x128xf32>
    %c0_9 = arith.constant 0 : index
    %c128 = arith.constant 128 : index
    %11 = vector.load %arg9[%c0_9, %c128] : memref<128x256xf32, #tpu.memory_space<vmem>>, vector<128x128xf32>
    %12 = tpu.transpose %10, [1, 0] : vector<128x128xf32> -> vector<128x128xf32>
    %cst_10 = arith.constant dense<0.000000e+00> : vector<128x128xf32>
    %13 = tpu.matmul %9, %12, %cst_10 {dimension_numbers = #tpu.dot_dimension_numbers<[1], [0], [0], [1], [0, 0, 1, 1], [], []>} : vector<128x128xf32>, vector<128x128xf32>, vector<128x128xf32> -> vector<128x128xf32>
    %cst_11 = arith.constant dense<0xFF800000> : vector<128xf32>
    %14 = vector.multi_reduction <maximumf>, %13, %cst_11 [1] : vector<128x128xf32> to vector<128xf32>
    %15 = vector.shape_cast %14 : vector<128xf32> to vector<128x1xf32>
    %16 = vector.broadcast %15 : vector<128x1xf32> to vector<128x128xf32>
    %17 = arith.subf %13, %16 : vector<128x128xf32>
    %18 = math.exp %17 : vector<128x128xf32>
    %cst_12 = arith.constant dense<0.000000e+00> : vector<128xf32>
    %19 = vector.multi_reduction <add>, %18, %cst_12 [1] : vector<128x128xf32> to vector<128xf32>
    %20 = vector.shape_cast %19 : vector<128xf32> to vector<128x1xf32>
    %21 = tpu.reciprocal %20 {approx = true} : vector<128x1xf32> -> vector<128x1xf32>
    %22 = vector.broadcast %21 : vector<128x1xf32> to vector<128x128xf32>
    %23 = arith.mulf %18, %22 : vector<128x128xf32>
    %cst_13 = arith.constant dense<0.000000e+00> : vector<128x128xf32>
    %24 = tpu.matmul %23, %11, %cst_13 {dimension_numbers = #tpu.dot_dimension_numbers<[1], [0], [0], [1], [0, 0, 1, 1], [], []>} : vector<128x128xf32>, vector<128x128xf32>, vector<128x128xf32> -> vector<128x128xf32>
    %c0_14 = arith.constant 0 : index
    %c0_15 = arith.constant 0 : index
    %c0_16 = arith.constant 0 : index
    %25 = vector.load %arg8[%c0_14, %c0_15, %c0_16] : memref<1x128x128xf32, #tpu.memory_space<vmem>>, vector<1x128x128xf32>
    %26 = vector.shape_cast %25 : vector<1x128x128xf32> to vector<128x128xf32>
    %27 = vector.shape_cast %24 : vector<128x128xf32> to vector<1x128x128xf32>
    tpu.vector_store %arg8[%c0_14, %c0_15, %c0_16], %27 {strides = array<i32>} : memref<1x128x128xf32, #tpu.memory_space<vmem>>, vector<1x128x128xf32>,
    return
  }
  func.func @transform_0(%arg0: i32, %arg1: i32) -> (i32, i32, i32) {
    %c0_i32 = arith.constant 0 : i32
    %c0_i32_0 = arith.constant 0 : i32
    return %arg0, %arg1, %c0_i32 : i32, i32, i32
  }
  func.func @transform_1(%arg0: i32, %arg1: i32) -> (i32, i32, i32) {
    %c0_i32 = arith.constant 0 : i32
    %c0_i32_0 = arith.constant 0 : i32
    %c0_i32_1 = arith.constant 0 : i32
    return %arg0, %c0_i32, %c0_i32_0 : i32, i32, i32
  }
  func.func @transform_2(%arg0: i32, %arg1: i32) -> (i32, i32) {
    %c0_i32 = arith.constant 0 : i32
    %c0_i32_0 = arith.constant 0 : i32
    %c0_i32_1 = arith.constant 0 : i32
    return %c0_i32, %c0_i32_0 : i32, i32
  }
  func.func @transform_3(%arg0: i32, %arg1: i32) -> (i32, i32) {
    %c0_i32 = arith.constant 0 : i32
    %c0_i32_0 = arith.constant 0 : i32
    %c0_i32_1 = arith.constant 0 : i32
    return %c0_i32, %c0_i32_0 : i32, i32
  }
  func.func @transform_4(%arg0: i32, %arg1: i32) -> (i32, i32) {
    %c0_i32 = arith.constant 0 : i32
    %c0_i32_0 = arith.constant 0 : i32
    %c0_i32_1 = arith.constant 0 : i32
    return %c0_i32, %c0_i32_0 : i32, i32
  }
  func.func @transform_5(%arg0: i32, %arg1: i32) -> (i32, i32) {
    %c0_i32 = arith.constant 0 : i32
    %c0_i32_0 = arith.constant 0 : i32
    %c0_i32_1 = arith.constant 0 : i32
    return %c0_i32, %c0_i32_0 : i32, i32
  }
  func.func @transform_6(%arg0: i32, %arg1: i32) -> (i32, i32, i32) {
    %c0_i32 = arith.constant 0 : i32
    %c0_i32_0 = arith.constant 0 : i32
    return %arg0, %arg1, %c0_i32 : i32, i32, i32
  }
}

</mosaic_0001>

<bundles_post_ra>
// kernel: tpu_custom_call.1
= control target key start
LH: loop header
LB: loop body
LE: loop exit
PB: predicated region body
PF: predicated region fallthrough
CT: control target
= control target key end

     0   :  { %s2834_s0 = inlined_call_operand.hbm [shape: f32[2,128,128], index: 0, kind: input, shape index: {}]   ;;  %s2835_s1 = inlined_call_operand.hbm [shape: f32[2,128,128], index: 1, kind: input, shape index: {}]   ;;  %s2836_s2 = inlined_call_operand.hbm [shape: f32[128,128], index: 2, kind: input, shape index: {}]   ;;  %s2837_s3 = inlined_call_operand.hbm [shape: f32[128,256], index: 3, kind: input, shape index: {}]   ;;  %s2838_s4 = inlined_call_operand.vmem [shape: f32[1,128], index: 4, kind: input, shape index: {}]   ;;  %s2839_s5 = inlined_call_operand.vmem [shape: f32[1,256], index: 5, kind: input, shape index: {}]   ;;  %s2840_s6 = inlined_call_operand.hbm [shape: f32[2,128,128], index: 6, kind: output, shape index: {}]  }
   0x1   :  { %2851 = sst [smem:[#allocation21_spill]] %s2834_s0 }
   0x2   :  { %2852 = sst [smem:[#allocation22_spill]] %s2836_s2 }
   0x3   :  { %2853 = sst [smem:[#allocation23_spill]] %s2837_s3 }
   0x4   :  { %11 = vsyncpa [#allocation4], 0 }
   0x5   :  { %13 = vsyncpa [#allocation4 + $0x1], 0 }
   0x6   :  { %14 = vsyncpa [#allocation7], 0 }
   0x7   :  { %16 = vsyncpa [#allocation7 + $0x1], 0 }
   0x8   :  { %17 = vsyncpa [#allocation10], 0 }
   0x9   :  { %18 = vsyncpa [#allocation5], 0 }
   0xa   :  { %20 = vsyncpa [#allocation5 + $0x1], 0  ;;  %s2264_s21 = smov 0   ;;  %s2266_s22 = smov 0  }
   0xb   :  { %s2268_s23 = smov 0   ;;  %s2270_s24 = smov 0  }
   0xc   :  { %s2272_s25 = smov 0   ;;  %s2274_s26 = smov 0  }
   0xd LB: > { %2854 = sst [smem:[#allocation17_spill]] %s2203_s23  ;;  %s2295_s27 = sadd.s32 4294967295, %s2215_s26   ;;  %s2215_s26 = sphi %s2274_s26, %s26_s26   ;;  %s2211_s25 = sphi %s2272_s25, %s2881_s25   ;;  %s2207_s24 = sphi %s2270_s24, %s2880_s24   ;;  %s2203_s23 = sphi %s2268_s23, %s2879_s23   ;;  %s2199_s22 = sphi %s2266_s22, %s2883_s22   ;;  %s2195_s21 = sphi %s2264_s21, %s2882_s21  }
   0xe   : > { %2855 = sst [smem:[#allocation18_spill]] %s2211_s25  ;;  %s1428_s28 = sadd.s32 4294967294, %s2215_s26  }
   0xf   : > { %p60_p0 = scmp.ne.s32.totalorder %s2199_s22, %s2195_s21  ;;  %p2841_p1 = scmp.eq.s32.totalorder %s2295_s27, 0 }
  0x10   : > { %p202_p3 = scmp.eq.s32.totalorder %s1428_s28, 1  ;;  %p1429_p5 = scmp.ge.s32.totalorder %s2215_s26, 1 }
  0x11   : > { %p2304_p4 = por %p2841_p1, %p60_p0  ;;  %p209_p7 = scmp.lt.s32.totalorder %s2215_s26, 3 }
  0x12   : > { %p2309_p6 = por %p202_p3, %p60_p0  ;;  %s2217_s8 = smov [#allocation8]  }
  0x13   : > { %s2856_s29 = scalar_select %p2304_p4, 1, 0 }
  0x14   : > { %s2857_s30 = scalar_select %p2309_p6, 1, 0 }
  0x15   : > { %p2314_p8 = pnand %p1429_p5, %p209_p7  ;;  %s221_s9 = sshll.u32 %s2217_s8, 4  ;;  %s2318_s9 = int_to_ptr.vmem [resolvable:$true] %s221_s9 }
  0x16   : > { %s2218_s11 = smov [#allocation9]   ;;  %s2860_s2 = sld [smem:[#allocation22_spill]] }
  0x17   : > { %p1860_p9 = pneg %p2314_p8  ;;  %s234_s12 = sshll.u32 %s2218_s11, 4  ;;  %s2329_s12 = int_to_ptr.vmem [resolvable:$true] %s234_s12 }
  0x19   : > { %p2325_p11 = pnand %p1860_p9, %p2841_p1 }
  0x1b   : > { %p2007_p13 = pneg %p2325_p11 }
  0x1c   : > { %s2005_s15 = scalar_lea.hbm %s2860_s2, 2048 }
  0x1d   : > { %p2006_p12 = scmp.ne.s32.totalorder %s2860_s2, %s2005_s15  ;;  %p2012_p5 = scmp.lt.u32.totalorder %s2005_s15, %s2860_s2 }
  0x1f   : > { %p2008_p0 = pnand %p2007_p13, %p2006_p12 }
  0x21   : > { %p2009_p3 = pneg %p2008_p0 }
  0x23   : > { %p2014_p7 = pnand %p2012_p5, %p2009_p3 }
  0x25   : > { %2017 = shalt.err (!%p2014_p7)
}
  0x26   : > { %s2018_s20 = scalar_lea.vmem %s2318_s9, 2048  ;;  %p2026_p2 = scmp.lt.s32.totalorder %s2318_s9, %s2318_s9 }
  0x27   : > { %p2019_p9 = scmp.ne.s32.totalorder %s2318_s9, %s2018_s20  ;;  %p2027_p12 = scmp.lt.s32.totalorder %s2018_s20, %s2018_s20 }
  0x29   : > { %p2021_p10 = pnand %p2019_p9, %p2007_p13  ;;  %p2028_p0 = por %p2027_p12, %p2026_p2 }
  0x2b   : > { %p2022_p1 = pneg %p2021_p10 }
  0x2d   : > { %p2029_p6 = pnand %p2028_p0, %p2022_p1 }
  0x2f   : > { %2032 = shalt.err (!%p2029_p6)
}
  0x30   : > { %s2842_s28 = smov 128   ;;  %s2844_s8 = smov 8  }
  0x31   : > { %1863 = dma.hbm_to_vmem [thread:$0]  (!%p2325_p11), %s2860_s2, 2048, %s2318_s9, [#allocation7], %s2842_s28, %s2842_s28, %s2844_s8  }
  0x32   : > { %s2861_s3 = sld [smem:[#allocation23_spill]] }
  0x38   : > { %s2033_s16 = scalar_lea.hbm %s2861_s3, 4096 }
  0x39   : > { %p2034_p1 = scmp.ne.s32.totalorder %s2861_s3, %s2033_s16  ;;  %p2040_p10 = scmp.lt.u32.totalorder %s2033_s16, %s2861_s3 }
  0x3b   : > { %p2036_p2 = pnand %p2034_p1, %p2007_p13 }
  0x3d   : > { %p2037_p6 = pneg %p2036_p2 }
  0x3f   : > { %p2042_p3 = pnand %p2040_p10, %p2037_p6 }
  0x41   : > { %2045 = shalt.err (!%p2042_p3)
}
  0x42   : > { %s2046_s9 = scalar_lea.vmem %s2329_s12, 4096  ;;  %p2054_p12 = scmp.lt.s32.totalorder %s2329_s12, %s2329_s12 }
  0x43   : > { %p2047_p5 = scmp.ne.s32.totalorder %s2329_s12, %s2046_s9  ;;  %p2055_p0 = scmp.lt.s32.totalorder %s2046_s9, %s2046_s9 }
  0x45   : > { %p2049_p7 = pnand %p2047_p5, %p2007_p13  ;;  %p2056_p1 = por %p2055_p0, %p2054_p12 }
  0x47   : > { %p2050_p9 = pneg %p2049_p7 }
  0x49   : > { %p2057_p2 = pnand %p2056_p1, %p2050_p9 }
  0x4b   : > { %2060 = shalt.err (!%p2057_p2)
}
  0x4c   : > { %s2221_s11 = smov 256   ;;  %s2222_s13 = smov 16  }
  0x4d   : > { %1866 = dma.hbm_to_vmem [thread:$0]  (!%p2325_p11), %s2861_s3, 4096, %s2329_s12, [#allocation10], %s2221_s11, %s2221_s11, %s2222_s13  }
  0x4e   : > { %s38_s16 = sadd.s32 1, %s2211_s25  ;;  %s47_s17 = sadd.s32 1, %s2203_s23 }
  0x4f   : > { %p40_p13 = scmp.ge.s32.totalorder %s38_s16, 2  ;;  %p54_p6 = scmp.ne.s32.totalorder %s2203_s23, %s2199_s22 }
  0x50   : > { %p55_p10 = scmp.eq.s32.totalorder %s2215_s26, 0  ;;  %p1880_p3 = scmp.lt.s32.totalorder %s2215_s26, 2 }
  0x51   : > { %s2885_s16 = smov (%p40_p13, %s38_s16), 0  ;;  %p2863_p7 = scmp.eq.s32.totalorder %s2295_s27, 1 }
  0x52   : > { %2862 = sst [smem:[#allocation19_spill]] %s2885_s16  ;;  %p56_p5 = por %p55_p10, %p54_p6 }
  0x53   : > { %p2396_p9 = por %p2863_p7, %p54_p6  ;;  %s42_s10 = ssub.s32 %s2211_s25, %s2885_s16 }
  0x54   : > { %s254_s19 = sand.u32 1, %s2203_s23   ;;  %p45_p12 = scmp.eq.s32.totalorder %s42_s10, 0 }
  0x55   : > { %s2864_s18 = scalar_select %p2396_p9, 1, 0 }
  0x56   : > { %s2403_s12 = sshll.u32 %s254_s19, 7  ;;  %s1451_s20 = sshll.u32 %s2211_s25, 11 }
  0x57   : > { %s2407_s9 = scalar_select %p45_p12, %s2203_s23, %s47_s17  }
  0x58   : > { %s2866_s0 = sld [smem:[#allocation21_spill]]  ;;  %s258_s15 = scalar_lea.vmem [#allocation3], %s2403_s12 }
  0x59   : > { %2865 = sst [smem:[#allocation20_spill]] %s2407_s9  ;;  %s267_s28 = sshll.u32 %s258_s15, 4  ;;  %s2421_s28 = int_to_ptr.vmem [resolvable:$true] %s267_s28 }
  0x5a   : > { %p2417_p11 = pnand %p1880_p3, %p56_p5  ;;  %s2426_s11 = scalar_lea.hbm %s2835_s1, %s1451_s20 }
  0x5b   : > { %s2428_s13 = scalar_lea.sflag [#allocation4], %s254_s19 }
  0x5c   : > { %p2063_p1 = pneg %p2417_p11 }
  0x5e   : > { %s2412_s14 = scalar_lea.hbm %s2866_s0, %s1451_s20  ;;  %s2066_s16 = scalar_lea.hbm %s2866_s0, 4096 }
  0x5f   : > { %s2061_s2 = scalar_lea.hbm %s2412_s14, 2048  ;;  %p2067_p6 = scmp.lt.u32.totalorder %s2412_s14, %s2866_s0 }
  0x60   : > { %p2062_p0 = scmp.ne.s32.totalorder %s2412_s14, %s2061_s2  ;;  %p2068_p10 = scmp.lt.u32.totalorder %s2066_s16, %s2061_s2 }
  0x61   : > { %p2070_p5 = scmp.lt.u32.totalorder %s2061_s2, %s2412_s14 }
  0x62   : > { %p2064_p2 = pnand %p2063_p1, %p2062_p0  ;;  %p2069_p3 = por %p2068_p10, %p2067_p6 }
  0x64   : > { %p2065_p13 = pneg %p2064_p2  ;;  %p2071_p7 = por %p2070_p5, %p2069_p3 }
  0x66   : > { %p2072_p12 = pnand %p2071_p7, %p2065_p13 }
  0x68   : > { %2075 = shalt.err (!%p2072_p12)
}
  0x69   : > { %s2076_s8 = scalar_lea.vmem %s2421_s28, 2048  ;;  %s2223_s3 = smov [#allocation3]  }
  0x6a   : > { %p2077_p0 = scmp.ne.s32.totalorder %s2421_s28, %s2076_s8  ;;  %s2081_s19 = sshll.u32 %s2223_s3, 4  ;;  %s2082_s19 = int_to_ptr.vmem [resolvable:$false] %s2081_s19 }
  0x6b   : > { %s2083_s25 = scalar_lea.vmem %s2082_s19, 4096  ;;  %p2084_p4 = scmp.lt.s32.totalorder %s2421_s28, %s2082_s19 }
  0x6c   : > { %p2079_p2 = pnand %p2077_p0, %p2063_p1  ;;  %p2085_p6 = scmp.lt.s32.totalorder %s2083_s25, %s2076_s8 }
  0x6e   : > { %p2080_p9 = pneg %p2079_p2  ;;  %p2086_p10 = por %p2085_p6, %p2084_p4 }
  0x70   : > { %p2087_p3 = pnand %p2086_p10, %p2080_p9 }
  0x72   : > { %2090 = shalt.err (!%p2087_p3)
}
  0x73   : > { %s2868_s2 = smov 8   ;;  %s2869_s16 = smov 128  }
  0x74   : > { %1870 = dma.hbm_to_vmem [thread:$0]  (!%p2417_p11), %s2412_s14, 2048, %s2421_s28, %s2428_s13, %s2869_s16, %s2869_s16, %s2868_s2  }
  0x75   : > { %s281_s20 = scalar_lea.vmem [#allocation6], %s2403_s12  ;;  %s277_s17 = sand.u32 1, %s2215_s26  }
  0x76   : > { %s288_s9 = sshll.u32 %s281_s20, 4  ;;  %s2463_s15 = scalar_lea.sflag [#allocation7], %s277_s17  ;;  %s2461_s9 = int_to_ptr.vmem [resolvable:$true] %s288_s9 }
  0x77   : > { %s2091_s8 = scalar_lea.hbm %s2426_s11, 2048  ;;  %s2096_s25 = scalar_lea.hbm %s2835_s1, 4096 }
  0x78   : > { %p2092_p4 = scmp.ne.s32.totalorder %s2426_s11, %s2091_s8  ;;  %p2097_p5 = scmp.lt.u32.totalorder %s2426_s11, %s2835_s1 }
  0x79   : > { %p2098_p7 = scmp.lt.u32.totalorder %s2096_s25, %s2091_s8  ;;  %p2100_p0 = scmp.lt.u32.totalorder %s2091_s8, %s2426_s11 }
  0x7a   : > { %p2094_p9 = pnand %p2092_p4, %p2063_p1 }
  0x7b   : > { %p2099_p12 = por %p2098_p7, %p2097_p5 }
  0x7c   : > { %p2095_p13 = pneg %p2094_p9 }
  0x7d   : > { %p2101_p2 = por %p2100_p0, %p2099_p12 }
  0x7f   : > { %p2102_p6 = pnand %p2101_p2, %p2095_p13 }
  0x81   : > { %2105 = shalt.err (!%p2102_p6)
}
  0x82   : > { %s2106_s28 = scalar_lea.vmem %s2461_s9, 2048  ;;  %s2224_s12 = smov [#allocation6]  }
  0x83   : > { %p2107_p10 = scmp.ne.s32.totalorder %s2461_s9, %s2106_s28  ;;  %s2111_s14 = sshll.u32 %s2224_s12, 4  ;;  %s2112_s14 = int_to_ptr.vmem [resolvable:$false] %s2111_s14 }
  0x84   : > { %s2113_s0 = scalar_lea.vmem %s2112_s14, 4096  ;;  %p2114_p9 = scmp.lt.s32.totalorder %s2461_s9, %s2112_s14 }
  0x85   : > { %p2109_p3 = pnand %p2107_p10, %p2063_p1  ;;  %p2115_p5 = scmp.lt.s32.totalorder %s2113_s0, %s2106_s28 }
  0x87   : > { %p2110_p4 = pneg %p2109_p3  ;;  %p2116_p7 = por %p2115_p5, %p2114_p9 }
  0x89   : > { %p2117_p12 = pnand %p2116_p7, %p2110_p4 }
  0x8b   : > { %2120 = shalt.err (!%p2117_p12)
}
  0x8c   : > { %1873 = dma.hbm_to_vmem [thread:$0]  (!%p2417_p11), %s2426_s11, 2048, %s2461_s9, %s2463_s15, %s2869_s16, %s2869_s16, %s2868_s2  }
  0x8d   : > { %300 = sbr.rel (%p2314_p8) target bundleno = 1262 (0x4ee), region = 44  ;;  %s2495_s23 = sand.u32 (!%p2314_p8), 1, %s2199_s22  }
  0x8e   : > { %s2498_s13 = sshll.u32 (!%p2314_p8), %s2495_s23, 7  ;;  %s303_s10 = scalar_lea.sflag (!%p2314_p8), [#allocation4], %s2495_s23 }
  0x8f   : > { %s2502_s20 = scalar_lea.vmem (!%p2314_p8), [#allocation3], %s2498_s13  ;;  %p2870_p1 = scmp.ne.s32.totalorder (!%p2314_p8), %s2856_s29, 0 }
  0x94   : > { %2174 = dma.done.wait (%p2870_p1), %s303_s10, 2048  }
  0x95   : > { %2176 = vsyncadd (%p2870_p1), %s303_s10, 4294965248  ;;  %s311_s7 = sand.u32 1, %s2295_s27   ;;  %s2510_s2 = scalar_lea.vmem [#allocation6], %s2498_s13 }
  0x96   : > { %s312_s11 = scalar_lea.sflag [#allocation7], %s311_s7 }
  0x97   : > { %2178 = dma.done.wait (%p2870_p1), %s312_s11, 2048  }
  0x98   : > { %2180 = vsyncadd (%p2870_p1), %s312_s11, 4294965248  ;;  %p2871_p8 = scmp.eq.s32.totalorder %s2295_s27, 0 }
  0x9a   : > { %2182 = dma.done.wait (%p2871_p8), [#allocation7], 2048   ;;  %p2872_p11 = pmov %p2871_p8 }
  0x9b   : > { %p2873_p13 = pmov %p2871_p8 }
  0x9c   : > { %2184 = vsyncadd (%p2872_p11), [#allocation7], 4294965248 }
  0x9d   : > { %2186 = dma.done.wait (%p2873_p13), [#allocation10], 4096   ;;  %p2874_p0 = pmov %p2871_p8 }
  0x9e   : > { %v2225_v0 = vmov 0.0   ;;  %v380_v1 = vld [vmem:[#allocation9 + $0x8] sm:$0xff]  ;;  %v382_v2 = vld [vmem:[#allocation9 + $0x18] sm:$0xff]  ;;  %v379_v3 = vld [vmem:[#allocation9] sm:$0xff]  ;;  %s2760_s17 = scalar_lea.vmem [#allocation11], %s2498_s13  ;;  %s1453_s15 = sshll.u32 %s2207_s24, 11 }
  0x9f   : > { %2188 = vsyncadd (%p2874_p0), [#allocation10], 4294963200  ;;  %487 = vmatprep.mubr.f32.mxu0 %v2225_v0  ;;  %v1718_v4 = vpack.c.bf16 %v382_v2, %v380_v1  ;;  %v381_v5 = vld [vmem:[#allocation9 + $0x10] sm:$0xff]  ;;  %v384_v6 = vld [vmem:[#allocation9 + $0x28] sm:$0xff]  ;;  %s1298_s8 = sshll.u32 %s2760_s17, 4  ;;  %s2781_s25 = scalar_lea.hbm %s2840_s6, %s1453_s15  ;;  %s2783_s8 = int_to_ptr.vmem [resolvable:$true] %s1298_s8 }
  0xa0   : > { %v386_v7 = vld [vmem:[#allocation9 + $0x38] sm:$0xff]  ;;  %v1720_v8 = vpack.c.bf16 %v381_v5, %v379_v3  ;;  %v383_v10 = vld [vmem:[#allocation9 + $0x20] sm:$0xff]  ;;  %v385_v11 = vld [vmem:[#allocation9 + $0x30] sm:$0xff]  ;;  %s1283_s28 = scalar_lea.sflag [#allocation5], %s2495_s23  ;;  %s2121_s24 = scalar_lea.vmem %s2783_s8, 2048 }
  0xa1   : > { %v1722_v9 = vpack.c.bf16 %v386_v7, %v384_v6  ;;  %v388_v12 = vld [vmem:[#allocation9 + $0x48] sm:$0xff]  ;;  %1719 = vmatprep.subr.bf16.mxu0 %v1718_v4  ;;  %v390_v13 = vld [vmem:[#allocation9 + $0x58] sm:$0xff]  ;;  %v1724_v14 = vpack.c.bf16 %v385_v11, %v383_v10  ;;  %v387_v16 = vld [vmem:[#allocation9 + $0x40] sm:$0xff]  ;;  %p2122_p2 = scmp.ne.s32.totalorder %s2783_s8, %s2121_s24  ;;  %p2875_p6 = scmp.ne.s32.totalorder %s2864_s18, 0 }
  0xa2   : > { %1721 = vmatpush1.bf16.msra.mxu0 %v1720_v8  ;;  %v1726_v15 = vpack.c.bf16 %v390_v13, %v388_v12  ;;  %v389_v17 = vld [vmem:[#allocation9 + $0x50] sm:$0xff]  ;;  %v392_v18 = vld [vmem:[#allocation9 + $0x68] sm:$0xff]  ;;  %v394_v19 = vld [vmem:[#allocation9 + $0x78] sm:$0xff]  ;;  %s2226_s12 = smov [#allocation11]  }
  0xa3   : > { %1723 = vmatprep.subr.bf16.mxu0 %v1722_v9  ;;  %v1728_v20 = vpack.c.bf16 %v389_v17, %v387_v16  ;;  %v1730_v21 = vpack.c.bf16 %v394_v19, %v392_v18  ;;  %v391_v22 = vld [vmem:[#allocation9 + $0x60] sm:$0xff]  ;;  %v393_v23 = vld [vmem:[#allocation9 + $0x70] sm:$0xff]  ;;  %v396_v24 = vld [vmem:[#allocation9 + $0x88] sm:$0xff]  ;;  %p2123_p10 = pnand %p2122_p2, %p2875_p6  ;;  %s2125_s14 = sshll.u32 %s2226_s12, 4  ;;  %s2126_s14 = int_to_ptr.vmem [resolvable:$false] %s2125_s14 }
  0xa4   : > { %v398_v25 = vld [vmem:[#allocation9 + $0x98] sm:$0xff]  ;;  %v1732_v26 = vpack.c.bf16 %v393_v23, %v391_v22  ;;  %v395_v28 = vld [vmem:[#allocation9 + $0x80] sm:$0xff]  ;;  %v397_v29 = vld [vmem:[#allocation9 + $0x90] sm:$0xff]  ;;  %s2127_s0 = scalar_lea.vmem %s2126_s14, 4096  ;;  %p2128_p4 = scmp.lt.s32.totalorder %s2783_s8, %s2126_s14 }
  0xa5   : > { %v1734_v27 = vpack.c.bf16 %v398_v25, %v396_v24  ;;  %v400_v30 = vld [vmem:[#allocation9 + $0xa8] sm:$0xff]  ;;  %v402_v31 = vld [vmem:[#allocation9 + $0xb8] sm:$0xff]  ;;  %v632_v32 = vld [vmem:[#allocation8] sm:$0xff]  ;;  %v1736_v37 = vpack.c.bf16 %v397_v29, %v395_v28  ;;  %p2124_p3 = pneg %p2123_p10  ;;  %p2129_p9 = scmp.lt.s32.totalorder %s2127_s0, %s2121_s24 }
  0xa6   : > { %1725 = vmatpush1.bf16.msra.mxu0 %v1724_v14  ;;  %v633_v33 = vld [vmem:[#allocation8 + $0x8] sm:$0xff]  ;;  %v634_v35 = vld [vmem:[#allocation8 + $0x10] sm:$0xff]  ;;  %v635_v36 = vld [vmem:[#allocation8 + $0x18] sm:$0xff]  ;;  %v1738_v41 = vpack.c.bf16 %v402_v31, %v400_v30 }
  0xa7   : > { %1727 = vmatprep.subr.bf16.mxu0 %v1726_v15  ;;  %v1750_v34 = vpack.c.bf16 %v633_v33, %v632_v32  ;;  %v1754_v38 = vpack.c.bf16 %v635_v36, %v634_v35  ;;  %v636_v39 = vld [vmem:[#allocation8 + $0x20] sm:$0xff]  ;;  %v637_v40 = vld [vmem:[#allocation8 + $0x28] sm:$0xff]  ;;  %v401_v43 = vld [vmem:[#allocation9 + $0xb0] sm:$0xff]  ;;  %p2130_p5 = por %p2129_p9, %p2128_p4 }
  0xa8   : > { %v399_v42 = vld [vmem:[#allocation9 + $0xa0] sm:$0xff]  ;;  %v404_v44 = vld [vmem:[#allocation9 + $0xc8] sm:$0xff]  ;;  %v406_v45 = vld [vmem:[#allocation9 + $0xd8] sm:$0xff]  ;;  %v1758_v46 = vpack.c.bf16 %v637_v40, %v636_v39 }
  0xa9   : > { %1751 = vmatprep.subr.bf16.mxu1 %v1750_v34  ;;  %v1740_v47 = vpack.c.bf16 %v401_v43, %v399_v42  ;;  %v638_v48 = vld [vmem:[#allocation8 + $0x30] sm:$0xff]  ;;  %v639_v49 = vld [vmem:[#allocation8 + $0x38] sm:$0xff]  ;;  %v1742_v50 = vpack.c.bf16 %v406_v45, %v404_v44  ;;  %v403_v51 = vld [vmem:[#allocation9 + $0xc0] sm:$0xff]  ;;  %v413_v42 = vlaneseq  ;;  %p2131_p7 = pnand %p2130_p5, %p2124_p3 }
  0xaa   : > { %1729 = vmatpush1.bf16.msra.mxu0 %v1728_v20  ;;  %1753 = vmatpush3.bf16.msra.mxu1 %v1750_v34  ;;  %v405_v52 = vld [vmem:[#allocation9 + $0xd0] sm:$0xff]  ;;  %v616_v53 = vld [vmem:[%s2502_s20] sm:$0xff]  ;;  %v408_v54 = vld [vmem:[#allocation9 + $0xe8] sm:$0xff]  ;;  %v1762_v56 = vpack.c.bf16 %v639_v49, %v638_v48 }
  0xab   : > { %1731 = vmatprep.subr.bf16.mxu0 %v1730_v21  ;;  %1755 = vmatprep.subr.bf16.mxu1 %v1754_v38  ;;  %v410_v55 = vld [vmem:[#allocation9 + $0xf8] sm:$0xff]  ;;  %v1744_v57 = vpack.c.bf16 %v405_v52, %v403_v51  ;;  %v640_v58 = vld [vmem:[#allocation8 + $0x40] sm:$0xff]  ;;  %v641_v59 = vld [vmem:[#allocation8 + $0x48] sm:$0xff]  ;;  %v414_v43 = vshrl.u32 %v413_v42, 7 }
  0xac   : > { %1582 = vmatprep.mubr.f32.mxu1 %v616_v53  ;;  %v1746_v60 = vpack.c.bf16 %v410_v55, %v408_v54  ;;  %v407_v61 = vld [vmem:[#allocation9 + $0xe0] sm:$0xff]  ;;  %v409_v62 = vld [vmem:[#allocation9 + $0xf0] sm:$0xff]  ;;  %v1766_v63 = vpack.c.bf16 %v641_v59, %v640_v58  ;;  %v643_v3 = vld [vmem:[#allocation8 + $0x58] sm:$0xff] }
  0xad   : > { %v1748_v1 = vpack.c.bf16 %v409_v62, %v407_v61  ;;  %v642_v2 = vld [vmem:[#allocation8 + $0x50] sm:$0xff]  ;;  %v363_v5 = vld [vmem:[%s2510_s2] sm:$0xff]  ;;  %v645_v7 = vld [vmem:[#allocation8 + $0x68] sm:$0xff]  ;;  %v415_v44 = vsub.s32 0, %v414_v43 }
  0xae   : > { %1733 = vmatpush1.bf16.msra.mxu0 %v1732_v26  ;;  %1757 = vmatpush3.bf16.msra.mxu1 %v1754_v38  ;;  %v1770_v4 = vpack.c.bf16 %v643_v3, %v642_v2  ;;  %v644_v6 = vld [vmem:[#allocation8 + $0x60] sm:$0xff]  ;;  %v364_v9 = vld [vmem:[%s2510_s2 + $0x8] sm:$0xff]  ;;  %v646_v10 = vld [vmem:[#allocation8 + $0x70] sm:$0xff] }
  0xaf   : > { %1735 = vmatprep.subr.bf16.mxu0 %v1734_v27  ;;  %1759 = vmatprep.subr.bf16.mxu1 %v1758_v46  ;;  %v1774_v8 = vpack.c.bf16 %v645_v7, %v644_v6  ;;  %v647_v11 = vld [vmem:[#allocation8 + $0x78] sm:$0xff]  ;;  %v365_v13 = vld [vmem:[%s2510_s2 + $0x10] sm:$0xff]  ;;  %v617_v15 = vld [vmem:[%s2502_s20 + $0x8] sm:$0xff] }
  0xb0   : > { %v1778_v12 = vpack.c.bf16 %v647_v11, %v646_v10  ;;  %v366_v14 = vld [vmem:[%s2510_s2 + $0x18] sm:$0xff]  ;;  %v618_v16 = vld [vmem:[%s2502_s20 + $0x10] sm:$0xff]  ;;  %v367_v17 = vld [vmem:[%s2510_s2 + $0x20] sm:$0xff] }
  0xb1   : > { %v619_v18 = vld [vmem:[%s2502_s20 + $0x18] sm:$0xff]  ;;  %v620_v19 = vld [vmem:[%s2502_s20 + $0x20] sm:$0xff]  ;;  %v368_v20 = vld [vmem:[%s2510_s2 + $0x28] sm:$0xff] }
  0xb2   : > { %1737 = vmatpush1.bf16.msra.mxu0 %v1736_v37  ;;  %1761 = vmatpush3.bf16.msra.mxu1 %v1758_v46  ;;  %v621_v21 = vld [vmem:[%s2502_s20 + $0x28] sm:$0xff]  ;;  %v622_v22 = vld [vmem:[%s2502_s20 + $0x30] sm:$0xff]  ;;  %v623_v24 = vld [vmem:[%s2502_s20 + $0x38] sm:$0xff]  ;;  %v419_v46 = vsub.s32 1, %v414_v43 }
  0xb3   : > { %1739 = vmatprep.subr.bf16.mxu0 %v1738_v41  ;;  %1763 = vmatprep.subr.bf16.mxu1 %v1762_v56  ;;  %v369_v23 = vld [vmem:[%s2510_s2 + $0x30] sm:$0xff]  ;;  %v624_v25 = vld [vmem:[%s2502_s20 + $0x40] sm:$0xff]  ;;  %v370_v26 = vld [vmem:[%s2510_s2 + $0x38] sm:$0xff] }
  0xb4   : > { %v625_v27 = vld [vmem:[%s2502_s20 + $0x48] sm:$0xff]  ;;  %v626_v28 = vld [vmem:[%s2502_s20 + $0x50] sm:$0xff]  ;;  %v371_v29 = vld [vmem:[%s2510_s2 + $0x40] sm:$0xff] }
  0xb5   : > { %v627_v30 = vld [vmem:[%s2502_s20 + $0x58] sm:$0xff]  ;;  %v628_v31 = vld [vmem:[%s2502_s20 + $0x60] sm:$0xff]  ;;  %v372_v32 = vld [vmem:[%s2510_s2 + $0x48] sm:$0xff] }
  0xb6   : > { %1741 = vmatpush1.bf16.msra.mxu0 %v1740_v47  ;;  %1765 = vmatpush3.bf16.msra.mxu1 %v1762_v56  ;;  %v629_v33 = vld [vmem:[%s2502_s20 + $0x68] sm:$0xff]  ;;  %v630_v34 = vld [vmem:[%s2502_s20 + $0x70] sm:$0xff]  ;;  %v631_v36 = vld [vmem:[%s2502_s20 + $0x78] sm:$0xff] }
  0xb7   : > { %1743 = vmatprep.subr.bf16.mxu0 %v1742_v50  ;;  %1767 = vmatprep.subr.bf16.mxu1 %v1766_v63  ;;  %v373_v35 = vld [vmem:[%s2510_s2 + $0x50] sm:$0xff]  ;;  %v374_v37 = vld [vmem:[%s2510_s2 + $0x58] sm:$0xff]  ;;  %v375_v38 = vld [vmem:[%s2510_s2 + $0x60] sm:$0xff] }
  0xb8   : > { %v376_v39 = vld [vmem:[%s2510_s2 + $0x68] sm:$0xff]  ;;  %v377_v40 = vld [vmem:[%s2510_s2 + $0x70] sm:$0xff]  ;;  %v378_v41 = vld [vmem:[%s2510_s2 + $0x78] sm:$0xff] }
  0xb9   : > { %v411_v45 = vld [vmem:[%s2839_s5] sm:$0x3] }
  0xba   : > { %1745 = vmatpush1.bf16.msra.mxu0 %v1744_v57  ;;  %1769 = vmatpush3.bf16.msra.mxu1 %v1766_v63  ;;  %v2575_v48 = vrot.slane %v411_v45, %v415_v44  ;;  %v2577_v50 = vrot.slane %v411_v45, %v419_v46 }
  0xbb   : > { %1747 = vmatprep.subr.bf16.mxu0 %v1746_v60  ;;  %1771 = vmatprep.subr.bf16.mxu1 %v1770_v4 }
  0xbe   : > { %1749 = vmatpush1.bf16.msra.mxu0 %v1748_v1  ;;  %1773 = vmatpush3.bf16.msra.mxu1 %v1770_v4  ;;  %v2588_v1 = vld [vmem:[%s2838_s4] ss:$0 sm:$0xff] }
  0xbf   : > { %1775 = vmatprep.subr.bf16.mxu1 %v1774_v8 }
  0xc1   : > { %488 = vmatmul.mubr.f32.vlgmr.msra.gmra.mrb[0].mxu0 %v363_v5 }
  0xc2   : > { %493 = vmatprep.mubr.f32.mxu0 %v2225_v0  ;;  %1777 = vmatpush3.bf16.msra.mxu1 %v1774_v8 }
  0xc3   : > { %1779 = vmatprep.subr.bf16.mxu1 %v1778_v12 }
  0xc5   : > { %494 = vmatmul.mubr.f32.gmra.mrb[2].mxu0 %v364_v9 }
  0xc6   : > { %499 = vmatprep.mubr.f32.mxu0 %v2225_v0  ;;  %1781 = vmatpush3.bf16.msra.mxu1 %v1778_v12 }
  0xc9   : > { %500 = vmatmul.mubr.f32.gmra.mrb[4].mxu0 %v365_v13  ;;  %1583 = vmatmul.mubr.f32.vlgmr.msra.gmra.mrb[0].mxu1 %v617_v15 }
  0xca   : > { %505 = vmatprep.mubr.f32.mxu0 %v2225_v0  ;;  %1585 = vmatprep.mubr.f32.mxu1 %v618_v16 }
  0xcd   : > { %506 = vmatmul.mubr.f32.gmra.mrb[6].mxu0 %v366_v14  ;;  %1586 = vmatmul.mubr.f32.gmra.mrb[2].mxu1 %v619_v18 }
  0xce   : > { %511 = vmatprep.mubr.f32.mxu0 %v2225_v0  ;;  %1588 = vmatprep.mubr.f32.mxu1 %v620_v19 }
  0xd1   : > { %512 = vmatmul.mubr.f32.gmra.mrb[8].mxu0 %v367_v17  ;;  %1589 = vmatmul.mubr.f32.gmra.mrb[4].mxu1 %v621_v21 }
  0xd2   : > { %517 = vmatprep.mubr.f32.mxu0 %v2225_v0  ;;  %1591 = vmatprep.mubr.f32.mxu1 %v622_v22 }
  0xd5   : > { %518 = vmatmul.mubr.f32.gmra.mrb[10].mxu0 %v368_v20  ;;  %1592 = vmatmul.mubr.f32.gmra.mrb[6].mxu1 %v623_v24 }
  0xd6   : > { %523 = vmatprep.mubr.f32.mxu0 %v2225_v0  ;;  %1594 = vmatprep.mubr.f32.mxu1 %v624_v25 }
  0xd9   : > { %524 = vmatmul.mubr.f32.gmra.mrb[12].mxu0 %v369_v23  ;;  %1595 = vmatmul.mubr.f32.gmra.mrb[8].mxu1 %v625_v27 }
  0xda   : > { %529 = vmatprep.mubr.f32.mxu0 %v2225_v0  ;;  %1597 = vmatprep.mubr.f32.mxu1 %v626_v28 }
  0xdd   : > { %530 = vmatmul.mubr.f32.gmra.mrb[14].mxu0 %v370_v26  ;;  %1598 = vmatmul.mubr.f32.gmra.mrb[10].mxu1 %v627_v30 }
  0xde   : > { %535 = vmatprep.mubr.f32.mxu0 %v2225_v0  ;;  %1600 = vmatprep.mubr.f32.mxu1 %v628_v31 }
  0xe1   : > { %536 = vmatmul.mubr.f32.gmra.mrb[16].mxu0 %v371_v29  ;;  %1601 = vmatmul.mubr.f32.gmra.mrb[12].mxu1 %v629_v33 }
  0xe2   : > { %541 = vmatprep.mubr.f32.mxu0 %v2225_v0  ;;  %1603 = vmatprep.mubr.f32.mxu1 %v630_v34 }
  0xe5   : > { %542 = vmatmul.mubr.f32.gmra.mrb[18].mxu0 %v372_v32  ;;  %1604 = vmatmul.mubr.f32.gmra.mrb[14].mxu1 %v631_v36 }
  0xe6   : > { %547 = vmatprep.mubr.f32.mxu0 %v2225_v0 }
  0xe9   : > { %548 = vmatmul.mubr.f32.gmra.mrb[20].mxu0 %v373_v35 }
  0xea   : > { %553 = vmatprep.mubr.f32.mxu0 %v2225_v0 }
  0xed   : > { %554 = vmatmul.mubr.f32.gmra.mrb[22].mxu0 %v374_v37 }
  0xee   : > { %559 = vmatprep.mubr.f32.mxu0 %v2225_v0 }
  0xf1   : > { %560 = vmatmul.mubr.f32.gmra.mrb[24].mxu0 %v375_v38 }
  0xf2   : > { %565 = vmatprep.mubr.f32.mxu0 %v2225_v0 }
  0xf5   : > { %566 = vmatmul.mubr.f32.gmra.mrb[26].mxu0 %v376_v39 }
  0xf6   : > { %571 = vmatprep.mubr.f32.mxu0 %v2225_v0 }
  0xf9   : > { %572 = vmatmul.mubr.f32.gmra.mrb[28].mxu0 %v377_v40 }
  0xfa   : > { %577 = vmatprep.mubr.f32.mxu0 %v2225_v0 }
  0xfd   : > { %578 = vmatmul.mubr.f32.gmra.mrb[30].mxu0 %v378_v41 }
 0x194   : > { %v489_v47 = vpop.f32.mrb[0].mxu0 }
 0x195   : > { %v491_v49 = vpop.f32.mrb[1].mxu0  ;;  %v490_v52 = vadd.f32 %v489_v47, %v2575_v48 }
 0x196   : > { %v492_v54 = vadd.f32 %v491_v49, %v2577_v50 }
 0x198   : > { %v495_v51 = vpop.f32.mrb[2].mxu0 }
 0x199   : > { %v496_v0 = vadd.f32 %v495_v51, %v2575_v48  ;;  %v497_v53 = vpop.f32.mrb[3].mxu0 }
 0x19a   : > { %v498_v55 = vadd.f32 %v497_v53, %v2577_v50 }
 0x19b   : > { %v1782_v56 = vpack.c.bf16 %v496_v0, %v490_v52 }
 0x19c   : > { %v1814_v57 = vpack.c.bf16 %v498_v55, %v492_v54  ;;  %v501_v58 = vpop.f32.mrb[4].mxu0  ;;  %v2592_v4 = vpop.f32.mrb[0].mxu1 }
 0x19d   : > { %v503_v59 = vpop.f32.mrb[5].mxu0  ;;  %1783 = vmatprep.subr.bf16.mxu0 %v1782_v56  ;;  %v502_v61 = vadd.f32 %v501_v58, %v2575_v48  ;;  %v721_v6 = vpop.f32.mrb[1].mxu1 }
 0x19e   : > { %1785 = vmatpush3.bf16.xpose.msra.mxu0 %v1782_v56  ;;  %1815 = vmatprep.subr.bf16.mxu1 %v1814_v57  ;;  %v504_v2 = vadd.f32 %v503_v59, %v2577_v50  ;;  %v722_v9 = vadd.f32 %v2588_v1, %v721_v6 }
 0x19f   : > { %1817 = vmatpush3.bf16.msra.mxu1 %v1814_v57 }
 0x1a0   : > { %v507_v60 = vpop.f32.mrb[6].mxu0  ;;  %v2595_v11 = vpop.f32.mrb[2].mxu1  ;;  %1638 = vmatprep.mubr.f32.mxu0 %v722_v9 }
 0x1a1   : > { %v508_v62 = vadd.f32 %v507_v60, %v2575_v48  ;;  %v509_v63 = vpop.f32.mrb[7].mxu0  ;;  %v2597_v12 = vpop.f32.mrb[3].mxu1 }
 0x1a2   : > { %v510_v3 = vadd.f32 %v509_v63, %v2577_v50 }
 0x1a3   : > { %v1786_v5 = vpack.c.bf16 %v508_v62, %v502_v61 }
 0x1a4   : > { %v1818_v7 = vpack.c.bf16 %v510_v3, %v504_v2  ;;  %v513_v8 = vpop.f32.mrb[8].mxu0  ;;  %v2603_v19 = vpop.f32.mrb[4].mxu1 }
 0x1a5   : > { %v515_v10 = vpop.f32.mrb[9].mxu0  ;;  %1787 = vmatprep.subr.bf16.mxu0 %v1786_v5  ;;  %v514_v14 = vadd.f32 %v513_v8, %v2575_v48  ;;  %v2605_v21 = vpop.f32.mrb[5].mxu1 }
 0x1a6   : > { %1789 = vmatpush3.bf16.xpose.msra.mxu0 %v1786_v5  ;;  %1819 = vmatprep.subr.bf16.mxu1 %v1818_v7  ;;  %v516_v17 = vadd.f32 %v515_v10, %v2577_v50 }
 0x1a7   : > { %1821 = vmatpush3.bf16.msra.mxu1 %v1818_v7 }
 0x1a8   : > { %v519_v13 = vpop.f32.mrb[10].mxu0  ;;  %v1593_v25 = vpop.f32.mrb[6].mxu1 }
 0x1a9   : > { %v520_v15 = vadd.f32 %v519_v13, %v2575_v48  ;;  %v521_v16 = vpop.f32.mrb[11].mxu0  ;;  %v2608_v26 = vadd.f32 %v1593_v25, %v2588_v1  ;;  %v2610_v27 = vpop.f32.mrb[7].mxu1 }
 0x1aa   : > { %v522_v18 = vadd.f32 %v521_v16, %v2577_v50 }
 0x1ab   : > { %v1790_v20 = vpack.c.bf16 %v520_v15, %v514_v14 }
 0x1ac   : > { %v1822_v22 = vpack.c.bf16 %v522_v18, %v516_v17  ;;  %v525_v23 = vpop.f32.mrb[12].mxu0  ;;  %v1596_v34 = vpop.f32.mrb[8].mxu1 }
 0x1ad   : > { %v527_v24 = vpop.f32.mrb[13].mxu0  ;;  %1791 = vmatprep.subr.bf16.mxu0 %v1790_v20  ;;  %v526_v29 = vadd.f32 %v525_v23, %v2575_v48  ;;  %v2617_v36 = vadd.f32 %v1596_v34, %v2588_v1  ;;  %v761_v37 = vpop.f32.mrb[9].mxu1 }
 0x1ae   : > { %1793 = vmatpush3.bf16.xpose.msra.mxu0 %v1790_v20  ;;  %1823 = vmatprep.subr.bf16.mxu1 %v1822_v22  ;;  %v528_v32 = vadd.f32 %v527_v24, %v2577_v50  ;;  %v2620_v40 = vadd.f32 %v2588_v1, %v761_v37 }
 0x1af   : > { %1825 = vmatpush3.bf16.msra.mxu1 %v1822_v22 }
 0x1b0   : > { %v531_v28 = vpop.f32.mrb[14].mxu0  ;;  %v1599_v42 = vpop.f32.mrb[10].mxu1 }
 0x1b1   : > { %v532_v30 = vadd.f32 %v531_v28, %v2575_v48  ;;  %v533_v31 = vpop.f32.mrb[15].mxu0  ;;  %v2623_v43 = vadd.f32 %v1599_v42, %v2588_v1  ;;  %v771_v44 = vpop.f32.mrb[11].mxu1  ;;  %v747_v42 = vadd.f32 %v2603_v19, %v2588_v1 }
 0x1b2   : > { %v534_v33 = vadd.f32 %v533_v31, %v2577_v50  ;;  %v2626_v46 = vadd.f32 %v2588_v1, %v771_v44  ;;  %v752_v44 = vadd.f32 %v2588_v1, %v2610_v27 }
 0x1b3   : > { %v1794_v35 = vpack.c.bf16 %v532_v30, %v526_v29 }
 0x1b4   : > { %v1826_v38 = vpack.c.bf16 %v534_v33, %v528_v32  ;;  %v537_v39 = vpop.f32.mrb[16].mxu0  ;;  %v1602_v53 = vpop.f32.mrb[12].mxu1 }
 0x1b5   : > { %v539_v41 = vpop.f32.mrb[17].mxu0  ;;  %1795 = vmatprep.subr.bf16.mxu0 %v1794_v35  ;;  %v538_v47 = vadd.f32 %v537_v39, %v2575_v48  ;;  %v2633_v55 = vadd.f32 %v1602_v53, %v2588_v1  ;;  %v781_v56 = vpop.f32.mrb[13].mxu1  ;;  %v732_v39 = vadd.f32 %v2588_v1, %v2597_v12 }
 0x1b6   : > { %1797 = vmatpush3.bf16.xpose.msra.mxu0 %v1794_v35  ;;  %1827 = vmatprep.subr.bf16.mxu1 %v1826_v38  ;;  %v540_v52 = vadd.f32 %v539_v41, %v2577_v50  ;;  %v2636_v59 = vadd.f32 %v2588_v1, %v781_v56  ;;  %v727_v41 = vadd.f32 %v2592_v4, %v2588_v1 }
 0x1b7   : > { %1829 = vmatpush3.bf16.msra.mxu1 %v1826_v38 }
 0x1b8   : > { %v543_v45 = vpop.f32.mrb[18].mxu0  ;;  %v1605_v61 = vpop.f32.mrb[14].mxu1 }
 0x1b9   : > { %v544_v49 = vadd.f32 %v543_v45, %v2575_v48  ;;  %v545_v51 = vpop.f32.mrb[19].mxu0  ;;  %v797_v62 = vadd.f32 %v1605_v61, %v2588_v1  ;;  %v791_v63 = vpop.f32.mrb[15].mxu1 }
 0x1ba   : > { %v546_v0 = vadd.f32 %v545_v51, %v2577_v50  ;;  %v792_v3 = vadd.f32 %v2588_v1, %v791_v63 }
 0x1bb   : > { %v1798_v54 = vpack.c.bf16 %v544_v49, %v538_v47 }
 0x1bc   : > { %v1830_v57 = vpack.c.bf16 %v546_v0, %v540_v52  ;;  %v549_v58 = vpop.f32.mrb[20].mxu0 }
 0x1bd   : > { %v551_v60 = vpop.f32.mrb[21].mxu0  ;;  %1799 = vmatprep.subr.bf16.mxu0 %v1798_v54  ;;  %v550_v5 = vadd.f32 %v549_v58, %v2575_v48 }
 0x1be   : > { %1801 = vmatpush3.bf16.xpose.msra.mxu0 %v1798_v54  ;;  %1831 = vmatprep.subr.bf16.mxu1 %v1830_v57  ;;  %v552_v8 = vadd.f32 %v551_v60, %v2577_v50 }
 0x1bf   : > { %1833 = vmatpush3.bf16.msra.mxu1 %v1830_v57 }
 0x1c0   : > { %v555_v2 = vpop.f32.mrb[22].mxu0 }
 0x1c1   : > { %v556_v6 = vadd.f32 %v555_v2, %v2575_v48  ;;  %v557_v7 = vpop.f32.mrb[23].mxu0 }
 0x1c2   : > { %v558_v9 = vadd.f32 %v557_v7, %v2577_v50 }
 0x1c3   : > { %v1802_v10 = vpack.c.bf16 %v556_v6, %v550_v5 }
 0x1c4   : > { %v1834_v13 = vpack.c.bf16 %v558_v9, %v552_v8  ;;  %v561_v14 = vpop.f32.mrb[24].mxu0 }
 0x1c5   : > { %v563_v15 = vpop.f32.mrb[25].mxu0  ;;  %1803 = vmatprep.subr.bf16.mxu0 %v1802_v10  ;;  %v562_v17 = vadd.f32 %v561_v14, %v2575_v48 }
 0x1c6   : > { %1805 = vmatpush3.bf16.xpose.msra.mxu0 %v1802_v10  ;;  %1835 = vmatprep.subr.bf16.mxu1 %v1834_v13  ;;  %v564_v22 = vadd.f32 %v563_v15, %v2577_v50 }
 0x1c7   : > { %1837 = vmatpush3.bf16.msra.mxu1 %v1834_v13 }
 0x1c8   : > { %v567_v16 = vpop.f32.mrb[26].mxu0 }
 0x1c9   : > { %v568_v18 = vadd.f32 %v567_v16, %v2575_v48  ;;  %v569_v20 = vpop.f32.mrb[27].mxu0 }
 0x1ca   : > { %v570_v23 = vadd.f32 %v569_v20, %v2577_v50 }
 0x1cb   : > { %v1806_v24 = vpack.c.bf16 %v568_v18, %v562_v17 }
 0x1cc   : > { %v1838_v25 = vpack.c.bf16 %v570_v23, %v564_v22  ;;  %v573_v28 = vpop.f32.mrb[28].mxu0 }
 0x1cd   : > { %v575_v29 = vpop.f32.mrb[29].mxu0  ;;  %1807 = vmatprep.subr.bf16.mxu0 %v1806_v24  ;;  %v574_v31 = vadd.f32 %v573_v28, %v2575_v48 }
 0x1ce   : > { %1809 = vmatpush3.bf16.xpose.msra.mxu0 %v1806_v24  ;;  %1839 = vmatprep.subr.bf16.mxu1 %v1838_v25  ;;  %v576_v34 = vadd.f32 %v575_v29, %v2577_v50 }
 0x1cf   : > { %1841 = vmatpush3.bf16.msra.mxu1 %v1838_v25 }
 0x1d0   : > { %v579_v30 = vpop.f32.mrb[30].mxu0 }
 0x1d1   : > { %v580_v32 = vadd.f32 %v579_v30, %v2575_v48  ;;  %v581_v33 = vpop.f32.mrb[31].mxu0  ;;  %v742_v48 = vadd.f32 %v2588_v1, %v2605_v21 }
 0x1d2   : > { %v582_v35 = vadd.f32 %v581_v33, %v2577_v50  ;;  %v737_v50 = vadd.f32 %v2595_v11, %v2588_v1 }
 0x1d3   : > { %v1810_v37 = vpack.c.bf16 %v580_v32, %v574_v31 }
 0x1d4   : > { %v1842_v38 = vpack.c.bf16 %v582_v35, %v576_v34 }
 0x1d5   : > { %1811 = vmatprep.subr.bf16.mxu0 %v1810_v37 }
 0x1d6   : > { %1813 = vmatpush3.bf16.xpose.msra.mxu0 %v1810_v37  ;;  %1843 = vmatprep.subr.bf16.mxu1 %v1842_v38 }
 0x1d7   : > { %1845 = vmatpush3.bf16.msra.mxu1 %v1842_v38 }
 0x1dd   : > { %1639 = vmatmul.mubr.f32.vlgmr.msra.gmra.mrb[32].mxu0 %v727_v41 }
 0x1de   : > { %1641 = vmatprep.mubr.f32.mxu0 %v732_v39 }
 0x1e1   : > { %1642 = vmatmul.mubr.f32.gmra.mrb[34].mxu0 %v737_v50 }
 0x1e2   : > { %1644 = vmatprep.mubr.f32.mxu0 %v742_v48 }
 0x1e5   : > { %1645 = vmatmul.mubr.f32.gmra.mrb[36].mxu0 %v747_v42 }
 0x1e6   : > { %1647 = vmatprep.mubr.f32.mxu0 %v752_v44 }
 0x1e9   : > { %1648 = vmatmul.mubr.f32.gmra.mrb[38].mxu0 %v2608_v26 }
 0x1ea   : > { %1650 = vmatprep.mubr.f32.mxu0 %v2620_v40 }
 0x1ed   : > { %1651 = vmatmul.mubr.f32.gmra.mrb[40].mxu0 %v2617_v36 }
 0x1ee   : > { %1653 = vmatprep.mubr.f32.mxu0 %v2626_v46 }
 0x1f1   : > { %1654 = vmatmul.mubr.f32.gmra.mrb[42].mxu0 %v2623_v43 }
 0x1f2   : > { %1656 = vmatprep.mubr.f32.mxu0 %v2636_v59 }
 0x1f5   : > { %1657 = vmatmul.mubr.f32.gmra.mrb[44].mxu0 %v2633_v55 }
 0x1f6   : > { %1659 = vmatprep.mubr.f32.mxu0 %v792_v3 }
 0x1f9   : > { %1660 = vmatmul.mubr.f32.gmra.mrb[46].mxu0 %v797_v62 }
 0x2b0   : > { %v1640_v4 = vpop.f32.mrb[32].mxu0 }
 0x2b1   : > { %v898_v1 = vpop.f32.mrb[33].mxu0 }
 0x2b2   : > { %977 = vmax.xlane.f32.xlu0 %v898_v1 }
 0x2b4   : > { %v1643_v11 = vpop.f32.mrb[34].mxu0 }
 0x2b5   : > { %v908_v12 = vpop.f32.mrb[35].mxu0 }
 0x2b6   : > { %979 = vmax.xlane.f32.xlu0 %v1640_v4  ;;  %981 = vmax.xlane.f32.xlu1 %v908_v12 }
 0x2b8   : > { %v1646_v19 = vpop.f32.mrb[36].mxu0 }
 0x2b9   : > { %v918_v21 = vpop.f32.mrb[37].mxu0 }
 0x2ba   : > { %983 = vmax.xlane.f32.xlu1 %v1643_v11  ;;  %985 = vmax.xlane.f32.xlu0 %v918_v21 }
 0x2bc   : > { %v1649_v26 = vpop.f32.mrb[38].mxu0 }
 0x2bd   : > { %v928_v27 = vpop.f32.mrb[39].mxu0 }
 0x2be   : > { %987 = vmax.xlane.f32.xlu1 %v1646_v19  ;;  %989 = vmax.xlane.f32.xlu0 %v928_v27 }
 0x2c0   : > { %v2671_v36 = vpop.f32.mrb[40].mxu0 }
 0x2c1   : > { %v938_v40 = vpop.f32.mrb[41].mxu0 }
 0x2c2   : > { %991 = vmax.xlane.f32.xlu1 %v1649_v26  ;;  %993 = vmax.xlane.f32.xlu0 %v938_v40 }
 0x2c4   : > { %v2673_v43 = vpop.f32.mrb[42].mxu0 }
 0x2c5   : > { %v948_v45 = vpop.f32.mrb[43].mxu0 }
 0x2c6   : > { %995 = vmax.xlane.f32.xlu1 %v2671_v36  ;;  %997 = vmax.xlane.f32.xlu0 %v948_v45 }
 0x2c8   : > { %v2676_v46 = vpop.f32.mrb[44].mxu0 }
 0x2c9   : > { %v2678_v47 = vpop.f32.mrb[45].mxu0 }
 0x2ca   : > { %999 = vmax.xlane.f32.xlu1 %v2673_v43  ;;  %1001 = vmax.xlane.f32.xlu0 %v2678_v47 }
 0x2cc   : > { %v2682_v49 = vpop.f32.mrb[46].mxu0 }
 0x2cd   : > { %v2684_v51 = vpop.f32.mrb[47].mxu0 }
 0x2ce   : > { %1003 = vmax.xlane.f32.xlu1 %v2676_v46  ;;  %1005 = vmax.xlane.f32.xlu0 %v2684_v51 }
 0x2d2   : > { %1007 = vmax.xlane.f32.xlu1 %v2682_v49 }
 0x33f   : > { %v978_v52 = vpop.xlane.xlu0 %977 }
 0x340   : > { %v1009_v0 = vsub.f32 %v898_v1, %v978_v52 }
 0x342   : > { %v1025_v53 = vmul.f32 1.442695, %v1009_v0 }
 0x343   : > { %v980_v54 = vpop.xlane.xlu0 %979  ;;  %v982_v55 = vpop.xlane.xlu1 %981 }
 0x344   : > { %1941 = vpow2.f32 %v1025_v53  ;;  %v1010_v56 = vsub.f32 %v1640_v4, %v980_v54  ;;  %v1011_v57 = vsub.f32 %v908_v12, %v982_v55 }
 0x346   : > { %v1027_v58 = vmul.f32 1.442695, %v1010_v56  ;;  %v1029_v59 = vmul.f32 1.442695, %v1011_v57 }
 0x347   : > { %v984_v60 = vpop.xlane.xlu1 %983  ;;  %v986_v61 = vpop.xlane.xlu0 %985 }
 0x348   : > { %1943 = vpow2.f32 %v1027_v58  ;;  %v1012_v62 = vsub.f32 %v1643_v11, %v984_v60  ;;  %v1013_v63 = vsub.f32 %v918_v21, %v986_v61 }
 0x349   : > { %1945 = vpow2.f32 %v1029_v59 }
 0x34a   : > { %v1031_v2 = vmul.f32 1.442695, %v1012_v62  ;;  %v1033_v3 = vmul.f32 1.442695, %v1013_v63 }
 0x34b   : > { %v988_v5 = vpop.xlane.xlu1 %987  ;;  %v990_v6 = vpop.xlane.xlu0 %989 }
 0x34c   : > { %1947 = vpow2.f32 %v1031_v2  ;;  %v1014_v7 = vsub.f32 %v1646_v19, %v988_v5  ;;  %v1015_v8 = vsub.f32 %v928_v27, %v990_v6 }
 0x34d   : > { %1949 = vpow2.f32 %v1033_v3 }
 0x34e   : > { %v2689_v9 = vpop.eup %1941  ;;  %v1035_v10 = vmul.f32 1.442695, %v1014_v7  ;;  %v1037_v13 = vmul.f32 1.442695, %v1015_v8 }
 0x34f   : > { %v992_v14 = vpop.xlane.xlu1 %991  ;;  %v994_v15 = vpop.xlane.xlu0 %993  ;;  %1057 = vadd.xlane.f32.xlu0 %v2689_v9 }
 0x350   : > { %1951 = vpow2.f32 %v1035_v10  ;;  %v1016_v16 = vsub.f32 %v1649_v26, %v992_v14  ;;  %v1017_v17 = vsub.f32 %v938_v40, %v994_v15 }
 0x351   : > { %1953 = vpow2.f32 %v1037_v13 }
 0x352   : > { %v2692_v18 = vpop.eup %1943  ;;  %v1039_v20 = vmul.f32 1.442695, %v1016_v16  ;;  %v1041_v22 = vmul.f32 1.442695, %v1017_v17 }
 0x353   : > { %v2694_v23 = vpop.eup %1945  ;;  %v996_v24 = vpop.xlane.xlu1 %995  ;;  %1059 = vadd.xlane.f32.xlu1 %v2692_v18 }
 0x354   : > { %v998_v25 = vpop.xlane.xlu0 %997  ;;  %1955 = vpow2.f32 %v1039_v20  ;;  %v1018_v28 = vsub.f32 %v2671_v36, %v996_v24  ;;  %1061 = vadd.xlane.f32.xlu0 %v2694_v23 }
 0x355   : > { %v1019_v29 = vsub.f32 %v948_v45, %v998_v25  ;;  %1957 = vpow2.f32 %v1041_v22 }
 0x356   : > { %v2699_v30 = vpop.eup %1947  ;;  %v1043_v31 = vmul.f32 1.442695, %v1018_v28 }
 0x357   : > { %v1045_v32 = vmul.f32 1.442695, %v1019_v29  ;;  %v2701_v33 = vpop.eup %1949  ;;  %v1000_v34 = vpop.xlane.xlu1 %999  ;;  %1063 = vadd.xlane.f32.xlu1 %v2699_v30 }
 0x358   : > { %v1002_v35 = vpop.xlane.xlu0 %1001  ;;  %1959 = vpow2.f32 %v1043_v31  ;;  %v1020_v37 = vsub.f32 %v2673_v43, %v1000_v34  ;;  %1065 = vadd.xlane.f32.xlu0 %v2701_v33 }
 0x359   : > { %v1021_v38 = vsub.f32 %v2678_v47, %v1002_v35  ;;  %1961 = vpow2.f32 %v1045_v32 }
 0x35a   : > { %v2707_v39 = vpop.eup %1951  ;;  %v1047_v41 = vmul.f32 1.442695, %v1020_v37 }
 0x35b   : > { %v1049_v48 = vmul.f32 1.442695, %v1021_v38  ;;  %v2709_v50 = vpop.eup %1953  ;;  %v1004_v42 = vpop.xlane.xlu1 %1003  ;;  %1067 = vadd.xlane.f32.xlu1 %v2707_v39 }
 0x35c   : > { %v1006_v44 = vpop.xlane.xlu0 %1005  ;;  %1963 = vpow2.f32 %v1047_v41  ;;  %v1022_v4 = vsub.f32 %v2676_v46, %v1004_v42  ;;  %1069 = vadd.xlane.f32.xlu0 %v2709_v50 }
 0x35d   : > { %v1023_v1 = vsub.f32 %v2684_v51, %v1006_v44  ;;  %1965 = vpow2.f32 %v1049_v48 }
 0x35e   : > { %v2715_v11 = vpop.eup %1955  ;;  %v1051_v12 = vmul.f32 1.442695, %v1022_v4 }
 0x35f   : > { %v1053_v19 = vmul.f32 1.442695, %v1023_v1  ;;  %v2717_v21 = vpop.eup %1957  ;;  %1071 = vadd.xlane.f32.xlu1 %v2715_v11  ;;  %v1008_v26 = vpop.xlane.xlu1 %1007 }
 0x360   : > { %1967 = vpow2.f32 %v1051_v12  ;;  %v1024_v27 = vsub.f32 %v2682_v49, %v1008_v26  ;;  %1073 = vadd.xlane.f32.xlu0 %v2717_v21 }
 0x361   : > { %1969 = vpow2.f32 %v1053_v19 }
 0x362   : > { %v2722_v36 = vpop.eup %1959  ;;  %v1055_v40 = vmul.f32 1.442695, %v1024_v27 }
 0x363   : > { %v2724_v43 = vpop.eup %1961  ;;  %1075 = vadd.xlane.f32.xlu1 %v2722_v36 }
 0x364   : > { %1971 = vpow2.f32 %v1055_v40  ;;  %1077 = vadd.xlane.f32.xlu0 %v2724_v43 }
 0x366   : > { %v2728_v45 = vpop.eup %1963 }
 0x367   : > { %v2730_v46 = vpop.eup %1965  ;;  %1079 = vadd.xlane.f32.xlu1 %v2728_v45 }
 0x368   : > { %1081 = vadd.xlane.f32.xlu0 %v2730_v46 }
 0x36a   : > { %v2734_v47 = vpop.eup %1967 }
 0x36b   : > { %v2736_v49 = vpop.eup %1969  ;;  %1083 = vadd.xlane.f32.xlu1 %v2734_v47 }
 0x36c   : > { %1085 = vadd.xlane.f32.xlu0 %v2736_v49 }
 0x36e   : > { %v2740_v51 = vpop.eup %1971 }
 0x36f   : > { %1087 = vadd.xlane.f32.xlu1 %v2740_v51 }
 0x3dc   : > { %v1058_v52 = vpop.xlane.xlu0 %1057 }
 0x3dd   : > { %1973 = vrcp.f32 %v1058_v52 }
 0x3e0   : > { %v1060_v0 = vpop.xlane.xlu1 %1059 }
 0x3e1   : > { %1975 = vrcp.f32 %v1060_v0  ;;  %v1062_v53 = vpop.xlane.xlu0 %1061 }
 0x3e2   : > { %1977 = vrcp.f32 %v1062_v53 }
 0x3e4   : > { %v1064_v54 = vpop.xlane.xlu1 %1063 }
 0x3e5   : > { %1979 = vrcp.f32 %v1064_v54  ;;  %v1066_v55 = vpop.xlane.xlu0 %1065 }
 0x3e6   : > { %1981 = vrcp.f32 %v1066_v55 }
 0x3e7   : > { %v1974_v56 = vpop.eup %1973 }
 0x3e8   : > { %v1068_v57 = vpop.xlane.xlu1 %1067  ;;  %v1105_v58 = vmul.f32 %v1974_v56, %v2689_v9 }
 0x3e9   : > { %1983 = vrcp.f32 %v1068_v57  ;;  %v1070_v59 = vpop.xlane.xlu0 %1069 }
 0x3ea   : > { %1985 = vrcp.f32 %v1070_v59  ;;  %1694 = vmatprep.mubr.f32.mxu1 %v1105_v58 }
 0x3eb   : > { %v1976_v60 = vpop.eup %1975 }
 0x3ec   : > { %v1978_v61 = vpop.eup %1977  ;;  %v1106_v62 = vmul.f32 %v1976_v60, %v2692_v18  ;;  %v1072_v63 = vpop.xlane.xlu1 %1071 }
 0x3ed   : > { %1987 = vrcp.f32 %v1072_v63  ;;  %v1074_v2 = vpop.xlane.xlu0 %1073  ;;  %v1107_v3 = vmul.f32 %v1978_v61, %v2694_v23 }
 0x3ee   : > { %1989 = vrcp.f32 %v1074_v2  ;;  %1695 = vmatmul.mubr.f32.vlgmr.msra.gmra.mrb[16].mxu1 %v1106_v62 }
 0x3ef   : > { %v1980_v5 = vpop.eup %1979  ;;  %1697 = vmatprep.mubr.f32.mxu1 %v1107_v3 }
 0x3f0   : > { %v1982_v6 = vpop.eup %1981  ;;  %v1076_v7 = vpop.xlane.xlu1 %1075  ;;  %v1108_v8 = vmul.f32 %v1980_v5, %v2699_v30 }
 0x3f1   : > { %1991 = vrcp.f32 %v1076_v7  ;;  %v1078_v9 = vpop.xlane.xlu0 %1077  ;;  %v1109_v10 = vmul.f32 %v1982_v6, %v2701_v33 }
 0x3f2   : > { %1993 = vrcp.f32 %v1078_v9  ;;  %1698 = vmatmul.mubr.f32.gmra.mrb[18].mxu1 %v1108_v8 }
 0x3f3   : > { %v1984_v13 = vpop.eup %1983  ;;  %1700 = vmatprep.mubr.f32.mxu1 %v1109_v10 }
 0x3f4   : > { %v1986_v14 = vpop.eup %1985  ;;  %v1080_v15 = vpop.xlane.xlu1 %1079  ;;  %v1110_v16 = vmul.f32 %v1984_v13, %v2707_v39 }
 0x3f5   : > { %1995 = vrcp.f32 %v1080_v15  ;;  %v1082_v17 = vpop.xlane.xlu0 %1081  ;;  %v1111_v18 = vmul.f32 %v1986_v14, %v2709_v50 }
 0x3f6   : > { %1997 = vrcp.f32 %v1082_v17  ;;  %1701 = vmatmul.mubr.f32.gmra.mrb[20].mxu1 %v1110_v16 }
 0x3f7   : > { %v1988_v20 = vpop.eup %1987  ;;  %1703 = vmatprep.mubr.f32.mxu1 %v1111_v18 }
 0x3f8   : > { %v1990_v22 = vpop.eup %1989  ;;  %v1084_v23 = vpop.xlane.xlu1 %1083  ;;  %v1112_v24 = vmul.f32 %v1988_v20, %v2715_v11 }
 0x3f9   : > { %1999 = vrcp.f32 %v1084_v23  ;;  %v1086_v25 = vpop.xlane.xlu0 %1085  ;;  %v1113_v28 = vmul.f32 %v1990_v22, %v2717_v21 }
 0x3fa   : > { %2001 = vrcp.f32 %v1086_v25  ;;  %1704 = vmatmul.mubr.f32.gmra.mrb[22].mxu1 %v1112_v24 }
 0x3fb   : > { %v1992_v29 = vpop.eup %1991  ;;  %1706 = vmatprep.mubr.f32.mxu1 %v1113_v28 }
 0x3fc   : > { %v1994_v30 = vpop.eup %1993  ;;  %v1088_v31 = vpop.xlane.xlu1 %1087  ;;  %v1114_v32 = vmul.f32 %v1992_v29, %v2722_v36 }
 0x3fd   : > { %2003 = vrcp.f32 %v1088_v31  ;;  %v1115_v33 = vmul.f32 %v1994_v30, %v2724_v43 }
 0x3fe   : > { %1707 = vmatmul.mubr.f32.gmra.mrb[24].mxu1 %v1114_v32 }
 0x3ff   : > { %v1996_v34 = vpop.eup %1995  ;;  %1709 = vmatprep.mubr.f32.mxu1 %v1115_v33 }
 0x400   : > { %v1998_v35 = vpop.eup %1997  ;;  %v1116_v37 = vmul.f32 %v1996_v34, %v2728_v45 }
 0x401   : > { %v1117_v38 = vmul.f32 %v1998_v35, %v2730_v46 }
 0x402   : > { %1710 = vmatmul.mubr.f32.gmra.mrb[26].mxu1 %v1116_v37 }
 0x403   : > { %v2000_v39 = vpop.eup %1999  ;;  %1712 = vmatprep.mubr.f32.mxu1 %v1117_v38 }
 0x404   : > { %v2002_v41 = vpop.eup %2001  ;;  %v1118_v48 = vmul.f32 %v2000_v39, %v2734_v47 }
 0x405   : > { %v1119_v50 = vmul.f32 %v2002_v41, %v2736_v49 }
 0x406   : > { %1713 = vmatmul.mubr.f32.gmra.mrb[28].mxu1 %v1118_v48 }
 0x407   : > { %v2004_v42 = vpop.eup %2003  ;;  %1715 = vmatprep.mubr.f32.mxu1 %v1119_v50 }
 0x408   : > { %v1120_v44 = vmul.f32 %v2004_v42, %v2740_v51 }
 0x40a   : > { %1716 = vmatmul.mubr.f32.gmra.mrb[30].mxu1 %v1120_v44 }
 0x4c1   : > { %v1696_v4 = vpop.f32.mrb[16].mxu1 }
 0x4c2   : > { %1267 = vst [vmem:[%s2760_s17 + $0x8] sm:$0xff] %v1696_v4  ;;  %v1187_v1 = vpop.f32.mrb[17].mxu1 }
 0x4c3   : > { %1266 = vst [vmem:[%s2760_s17] sm:$0xff] %v1187_v1 }
 0x4c5   : > { %v1699_v11 = vpop.f32.mrb[18].mxu1 }
 0x4c6   : > { %1269 = vst [vmem:[%s2760_s17 + $0x18] sm:$0xff] %v1699_v11  ;;  %v1197_v12 = vpop.f32.mrb[19].mxu1 }
 0x4c7   : > { %1268 = vst [vmem:[%s2760_s17 + $0x10] sm:$0xff] %v1197_v12 }
 0x4c9   : > { %v1702_v19 = vpop.f32.mrb[20].mxu1 }
 0x4ca   : > { %1271 = vst [vmem:[%s2760_s17 + $0x28] sm:$0xff] %v1702_v19  ;;  %v1207_v21 = vpop.f32.mrb[21].mxu1 }
 0x4cb   : > { %1270 = vst [vmem:[%s2760_s17 + $0x20] sm:$0xff] %v1207_v21 }
 0x4cd   : > { %v1705_v26 = vpop.f32.mrb[22].mxu1 }
 0x4ce   : > { %1273 = vst [vmem:[%s2760_s17 + $0x38] sm:$0xff] %v1705_v26  ;;  %v1217_v27 = vpop.f32.mrb[23].mxu1 }
 0x4cf   : > { %1272 = vst [vmem:[%s2760_s17 + $0x30] sm:$0xff] %v1217_v27 }
 0x4d1   : > { %v1708_v36 = vpop.f32.mrb[24].mxu1 }
 0x4d2   : > { %1275 = vst [vmem:[%s2760_s17 + $0x48] sm:$0xff] %v1708_v36  ;;  %v1227_v40 = vpop.f32.mrb[25].mxu1 }
 0x4d3   : > { %1274 = vst [vmem:[%s2760_s17 + $0x40] sm:$0xff] %v1227_v40 }
 0x4d5   : > { %v1711_v43 = vpop.f32.mrb[26].mxu1 }
 0x4d6   : > { %1277 = vst [vmem:[%s2760_s17 + $0x58] sm:$0xff] %v1711_v43  ;;  %v1237_v45 = vpop.f32.mrb[27].mxu1 }
 0x4d7   : > { %1276 = vst [vmem:[%s2760_s17 + $0x50] sm:$0xff] %v1237_v45 }
 0x4d9   : > { %v1714_v46 = vpop.f32.mrb[28].mxu1 }
 0x4da   : > { %1279 = vst [vmem:[%s2760_s17 + $0x68] sm:$0xff] %v1714_v46  ;;  %v1247_v47 = vpop.f32.mrb[29].mxu1 }
 0x4db   : > { %1278 = vst [vmem:[%s2760_s17 + $0x60] sm:$0xff] %v1247_v47 }
 0x4dd   : > { %v1717_v49 = vpop.f32.mrb[30].mxu1 }
 0x4de   : > { %1281 = vst [vmem:[%s2760_s17 + $0x78] sm:$0xff] %v1717_v49  ;;  %v1257_v51 = vpop.f32.mrb[31].mxu1 }
 0x4df   : > { %1280 = vst [vmem:[%s2760_s17 + $0x70] sm:$0xff] %v1257_v51 }
 0x4e0   : > { %2134 = shalt.err (!%p2131_p7)
}
 0x4e1   : > { %s2135_s13 = scalar_lea.hbm %s2781_s25, 2048  ;;  %s2139_s7 = scalar_lea.hbm %s2840_s6, 4096 }
 0x4e2   : > { %p2136_p12 = scmp.ne.s32.totalorder %s2781_s25, %s2135_s13  ;;  %p2140_p11 = scmp.lt.u32.totalorder %s2781_s25, %s2840_s6 }
 0x4e3   : > { %p2141_p13 = scmp.lt.u32.totalorder %s2139_s7, %s2135_s13  ;;  %p2143_p2 = scmp.lt.u32.totalorder %s2135_s13, %s2781_s25 }
 0x4e4   : > { %p2137_p1 = pnand %p2136_p12, %p2875_p6 }
 0x4e5   : > { %p2142_p0 = por %p2141_p13, %p2140_p11 }
 0x4e6   : > { %p2138_p8 = pneg %p2137_p1 }
 0x4e7   : > { %p2144_p10 = por %p2143_p2, %p2142_p0 }
 0x4e9   : > { %p2145_p3 = pnand %p2144_p10, %p2138_p8 }
 0x4eb   : > { %2148 = shalt.err (!%p2145_p3)
}
 0x4ec   : > { %s2227_s27 = smov 128   ;;  %s2228_s29 = smov 8  }
 0x4ed   : > { %1858 = dma.vmem_to_hbm [thread:$0]  (%p2875_p6), %s2783_s8, 2048, %s2781_s25, %s1283_s28, %s2227_s27, %s2227_s27, %s2228_s29  }
 0x4ee PF: > { %s1313_s16 = sand.u32 1, %s2195_s21   ;;  %p2876_p4 = scmp.ne.s32.totalorder %s2857_s30, 0 }
 0x4ef   : > { %p2877_p9 = scmp.ge.s32.totalorder %s2215_s26, 2  ;;  %s1314_s9 = scalar_lea.sflag [#allocation5], %s1313_s16 }
 0x4f1   : > { %p1875_p5 = pnand %p2877_p9, %p2876_p4 }
 0x4f3   : > { %2190 = dma.done.wait (!%p1875_p5), %s1314_s9, 2048  }
 0x4f4   : > { %2192 = vsyncadd (!%p1875_p5), %s1314_s9, 4294965248  ;;  %s26_s26 = sadd.s32 1, %s2215_s26   ;;  %s2878_s17 = sld [smem:[#allocation17_spill]] }
 0x4f5   : > { %p23_p7 = scmp.ge.s32.totalorder %s26_s26, 4   ;;  %s2879_s23 = sld [smem:[#allocation20_spill]] }
 0x4f6   : > { %s2880_s24 = sld [smem:[#allocation18_spill]]  ;;  %s2881_s25 = sld [smem:[#allocation19_spill]] }
 0x4f7   : > { %s2882_s21 = smov %s2199_s22  ;;  %25 = sbr.rel (!%p23_p7) target bundleno = 13 (0xd), region = 114 }
 0x4fa   : > { %s2883_s22 = smov %s2878_s17 }
 0x4fe   :  { %1319 = vsyncpa [#allocation4], 1 }
 0x4ff   :  { %1321 = vsyncpa [#allocation4 + $0x1], 1 }
 0x500   :  { %1322 = vsyncpa [#allocation7], 1 }
 0x501   :  { %1324 = vsyncpa [#allocation7 + $0x1], 1 }
 0x502   :  { %1325 = vsyncpa [#allocation10], 1 }
 0x503   :  { %1326 = vsyncpa [#allocation5], 1 }
 0x504   :  { %1328 = vsyncpa [#allocation5 + $0x1], 1 }

</bundles_post_ra>
